<compile_context>
chip_gen: v7x
topology: tpu7x:2x2x1
jax: 0.10.0
libtpu: 0.0.40
codegen_flags: <defaults>
</compile_context>

<pallas_src>
import functools

import jax
import jax.numpy as jnp
from jax.experimental import pallas as pl
from jax.experimental.pallas import tpu as pltpu


def _round_up(x, m):
    return ((x + m - 1) // m) * m


def _choose_batch_tile(batch, block_b):
    """Pick the lane-axis batch tile TB (multiple of 128) and the padded batch size."""
    block_b = _round_up(max(128, min(int(block_b), 32768)), 128)
    b128 = _round_up(max(batch, 1), 128)
    if b128 <= block_b:
        # Whole batch fits in one step: still split into two balanced steps when big
        # enough so v7x's two TensorCores ("parallel" grid axis) both get work and the
        # DMA pipeline overlaps with compute.  Single TC chips: harmless.
        steps = 2 if b128 >= 256 else 1
    else:
        steps = pl.cdiv(b128, block_b)
    tb = _round_up(pl.cdiv(b128, steps), 128)
    return tb, steps * tb


def pack_params(params, matmul_dtype=jnp.bfloat16):
    """Pack per-layer (W: (out,in), b: (out,)) into zero-padded resident slabs.

    Row padding granularity is 8 for f32 (one sublane group, enables v5e row trimming)
    and 16 for bf16 (one packed vreg; trimming below 16 rows saves nothing in bf16).
    Zero-padded weight COLUMNS make the sigmoid(0)=0.5 values living in padded
    activation rows mathematically inert for the next layer.
    """
    gran = 8 if jnp.dtype(matmul_dtype).itemsize >= 4 else 16
    n_layers = len(params)
    rows = []
    r_in = _round_up(params[0][0].shape[1], gran)
    for w, _ in params:
        r_out = _round_up(w.shape[0], gran)
        rows.append((r_in, r_out))
        r_in = r_out
    r_pad = max(r for _, r in rows)
    c_pad = max(r for r, _ in rows)
    w_slab = jnp.zeros((n_layers, r_pad, c_pad), matmul_dtype)
    b_slab = jnp.zeros((n_layers, r_pad, 1), matmul_dtype)  # epilogue dtype == matmul dtype
    for l, (w, b) in enumerate(params):
        out_f, in_f = w.shape
        w_slab = w_slab.at[l, :out_f, :in_f].set(w.astype(matmul_dtype))
        b_slab = b_slab.at[l, :out_f, 0].set(b.astype(matmul_dtype))
    return w_slab, b_slab, tuple(rows)


def _make_red_kernel(layer_rows):
    """Build the fused MLP kernel.  layer_rows: static tuple of (rows_in, rows_out)."""

    def kernel(x_ref, w_ref, b_ref, o_ref):
        # x_ref: (rows_in0, TB)    features on sublanes, batch on the 128-wide lane axis
        # w_ref: (L, R_PAD, C_PAD) resident packed weights (matmul dtype)
        # b_ref: (L, R_PAD, 1)     resident packed biases  (epilogue dtype)
        # o_ref: (8, TB)           f32, lane-dense, full-sublane stores
        h = x_ref[...]
        for l, (r_in, r_out) in enumerate(layer_rows):            # statically unrolled
            w = w_ref[l, :r_out, :r_in]                           # static ref slice
            z = jnp.dot(w, h, preferred_element_type=jnp.float32)  # MXU, f32 accumulate
            zb = z.astype(b_ref.dtype) + b_ref[l, :r_out, :]      # epilogue dtype
            # sigmoid(x) = 0.5 * (tanh(x/2) + 1): one EUP transcendental per element.
            h = 0.5 * (jnp.tanh(0.5 * zb) + 1.0)
        o_ref[...] = h[: o_ref.shape[0], :].astype(o_ref.dtype)

    return kernel


@functools.partial(
    jax.jit,
    static_argnames=("matmul_dtype", "block_b", "feature_major_in", "feature_major_out"),
)
def red_forward(x, params, *, matmul_dtype=jnp.bfloat16, block_b=16384,
                feature_major_in=False, feature_major_out=False):
    """Forward pass matching the PyTorch `Red` module.

    x: (B, n_entradas) f32 — or (n_entradas, B) if feature_major_in=True (skips the
    wrapper transpose pass).  Returns (B, 4) f32, or (4, B) if feature_major_out=True.
    Pass matmul_dtype=jnp.float32 for a bit-faithful f32 path (also the v5e-preferred
    epilogue); the default bf16 path targets v6e/v7x's bf16 MXU/VPU/EUP.
    """
    if feature_major_in:
        n_in, batch = x.shape
    else:
        batch, n_in = x.shape
    assert n_in == params[0][0].shape[1]
    for l in range(1, len(params)):
        assert params[l][0].shape[1] == params[l - 1][0].shape[0]
    out_dim = params[-1][0].shape[0]

    w_slab, b_slab, layer_rows = pack_params(params, matmul_dtype)
    n_layers, r_pad, c_pad = w_slab.shape
    rows_in0 = layer_rows[0][0]
    out_rows = _round_up(out_dim, 8)          # full-sublane, unmasked output stores

    tb, b_pad = _choose_batch_tile(batch, block_b)

    # Layout plumbing: one fused XLA transpose+pad+cast pass (pad+cast only when the
    # caller already provides feature-major data).
    x_fm = x if feature_major_in else x.T
    xt = jnp.zeros((rows_in0, b_pad), matmul_dtype)
    xt = xt.at[:n_in, :batch].set(x_fm.astype(matmul_dtype))

    out = pl.pallas_call(
        _make_red_kernel(layer_rows),
        out_shape=jax.ShapeDtypeStruct((out_rows, b_pad), jnp.float32),
        grid=(b_pad // tb,),
        in_specs=[
            pl.BlockSpec((rows_in0, tb), lambda i: (0, i)),               # pipelined x
            pl.BlockSpec((n_layers, r_pad, c_pad), lambda i: (0, 0, 0)),  # resident W
            pl.BlockSpec((n_layers, r_pad, 1), lambda i: (0, 0, 0)),      # resident b
        ],
        out_specs=pl.BlockSpec((out_rows, tb), lambda i: (0, i)),
        compiler_params=pltpu.CompilerParams(
            dimension_semantics=("parallel",),     # batch steps shard across v7x TCs
            vmem_limit_bytes=64 * 1024 * 1024,     # headroom for block_b up to 32768
        ),
    )(xt, w_slab, b_slab)

    out = out[:out_dim, :batch]
    return out if feature_major_out else out.T


def init_linear(key, in_features, out_features):
    """PyTorch-style uniform(-1/sqrt(in), 1/sqrt(in)) init, PyTorch (out, in) layout."""
    kw, kb = jax.random.split(key)
    bound = 1.0 / jnp.sqrt(jnp.float32(in_features))
    w = jax.random.uniform(kw, (out_features, in_features), jnp.float32,
                           minval=-bound, maxval=bound)
    b = jax.random.uniform(kb, (out_features,), jnp.float32,
                           minval=-bound, maxval=bound)
    return w, b


def reference_forward(x, params):
    h = x
    for w, b in params:
        h = jax.nn.sigmoid(h @ w.T + b)
    return h


if __name__ == "__main__":
    key = jax.random.PRNGKey(0)
    k_x, k_x2, k1, k2, k3, k4 = jax.random.split(key, 6)

    n_entradas = 8   # stands in for x_train.shape[1] in the original script
    params = (
        init_linear(k1, n_entradas, 15),
        init_linear(k2, 15, 10),
        init_linear(k3, 10, 5),
        init_linear(k4, 5, 4),
    )

    # Small batch (single 128-wide grid step), matching the PyTorch forward semantics.
    x = jax.random.normal(k_x, (2, n_entradas), jnp.float32)
    ref = reference_forward(x, params)

    # Exact-ish f32 MXU path (f32 epilogue, trimmed padded rows).
    out_f32 = jax.block_until_ready(red_forward(x, params, matmul_dtype=jnp.float32))
    assert out_f32.shape == (2, 4)
    assert jnp.allclose(out_f32, ref, atol=1e-4, rtol=1e-4)

    # Default bf16 path (bf16 MXU inputs + bf16 bias/sigmoid epilogue).
    out_bf16 = jax.block_until_ready(red_forward(x, params))
    assert out_bf16.shape == (2, 4)
    assert jnp.allclose(out_bf16, ref, atol=3e-2, rtol=0.0)

    # Feature-major fast path (skips the wrapper transpose pass) matches the default.
    out_fm = jax.block_until_ready(red_forward(x.T, params, feature_major_in=True))
    assert out_fm.shape == (2, 4)
    assert jnp.allclose(out_fm, out_bf16, atol=1e-6, rtol=0.0)

    # Larger batch: exercises batch padding and a multi-step (>=2) pipelined grid.
    x2 = jax.random.normal(k_x2, (640, n_entradas), jnp.float32)
    out2 = jax.block_until_ready(red_forward(x2, params))
    assert out2.shape == (640, 4)
    assert jnp.allclose(out2, reference_forward(x2, params), atol=3e-2, rtol=0.0)

    print("KERNEL_OK")
</pallas_src>

<mosaic_0001>
module attributes {stable_mosaic.version = 11 : i64} {
  func.func @kernel(%arg0: i32, %arg1: memref<8x128xf32, #tpu.memory_space<vmem>>, %arg2: memref<4x16x16xf32, #tpu.memory_space<vmem>>, %arg3: memref<4x16x1xf32, #tpu.memory_space<vmem>>, %arg4: memref<8x128xf32, #tpu.memory_space<vmem>>) attributes {dimension_semantics = [#tpu.dimension_semantics<parallel>], iteration_bounds = array<i64: 1>, scalar_prefetch = 0 : i64, scratch_operands = 0 : i64, tpu.core_type = #tpu.core_type<tc>, window_params = [{transform_indices = @transform_0, window_bounds = array<i64: 8, 128>}, {pipeline_mode = #tpu.pipeline_mode<synchronous>, transform_indices = @transform_1, window_bounds = array<i64: 4, 16, 16>}, {pipeline_mode = #tpu.pipeline_mode<synchronous>, transform_indices = @transform_2, window_bounds = array<i64: 4, 16, 1>}, {transform_indices = @transform_3, window_bounds = array<i64: 8, 128>}]} {
    %c0 = arith.constant 0 : index
    %c0_0 = arith.constant 0 : index
    %0 = vector.load %arg1[%c0, %c0_0] : memref<8x128xf32, #tpu.memory_space<vmem>>, vector<8x128xf32>
    %c0_1 = arith.constant 0 : index
    %c0_2 = arith.constant 0 : index
    %c0_3 = arith.constant 0 : index
    %1 = vector.load %arg2[%c0_1, %c0_2, %c0_3] : memref<4x16x16xf32, #tpu.memory_space<vmem>>, vector<1x16x8xf32>
    %2 = vector.shape_cast %1 : vector<1x16x8xf32> to vector<16x8xf32>
    %cst = arith.constant dense<0.000000e+00> : vector<16x128xf32>
    %3 = tpu.matmul %2, %0, %cst {dimension_numbers = #tpu.dot_dimension_numbers<[1], [0], [0], [1], [0, 0, 1, 1], [], []>} : vector<16x8xf32>, vector<8x128xf32>, vector<16x128xf32> -> vector<16x128xf32>
    %c0_4 = arith.constant 0 : index
    %c0_5 = arith.constant 0 : index
    %c0_6 = arith.constant 0 : index
    %4 = vector.load %arg3[%c0_4, %c0_5, %c0_6] : memref<4x16x1xf32, #tpu.memory_space<vmem>>, vector<1x16x1xf32>
    %5 = vector.shape_cast %4 : vector<1x16x1xf32> to vector<16x1xf32>
    %6 = vector.broadcast %5 : vector<16x1xf32> to vector<16x128xf32>
    %7 = arith.addf %3, %6 : vector<16x128xf32>
    %cst_7 = arith.constant 5.000000e-01 : f32
    %8 = vector.broadcast %cst_7 : f32 to vector<16x128xf32>
    %9 = arith.mulf %8, %7 : vector<16x128xf32>
    %10 = math.tanh %9 : vector<16x128xf32>
    %cst_8 = arith.constant 1.000000e+00 : f32
    %11 = vector.broadcast %cst_8 : f32 to vector<16x128xf32>
    %12 = arith.addf %10, %11 : vector<16x128xf32>
    %cst_9 = arith.constant 5.000000e-01 : f32
    %13 = vector.broadcast %cst_9 : f32 to vector<16x128xf32>
    %14 = arith.mulf %13, %12 : vector<16x128xf32>
    %c1 = arith.constant 1 : index
    %c0_10 = arith.constant 0 : index
    %c0_11 = arith.constant 0 : index
    %15 = vector.load %arg2[%c1, %c0_10, %c0_11] : memref<4x16x16xf32, #tpu.memory_space<vmem>>, vector<1x16x16xf32>
    %16 = vector.shape_cast %15 : vector<1x16x16xf32> to vector<16x16xf32>
    %cst_12 = arith.constant dense<0.000000e+00> : vector<16x128xf32>
    %17 = tpu.matmul %16, %14, %cst_12 {dimension_numbers = #tpu.dot_dimension_numbers<[1], [0], [0], [1], [0, 0, 1, 1], [], []>} : vector<16x16xf32>, vector<16x128xf32>, vector<16x128xf32> -> vector<16x128xf32>
    %c1_13 = arith.constant 1 : index
    %c0_14 = arith.constant 0 : index
    %c0_15 = arith.constant 0 : index
    %18 = vector.load %arg3[%c1_13, %c0_14, %c0_15] : memref<4x16x1xf32, #tpu.memory_space<vmem>>, vector<1x16x1xf32>
    %19 = vector.shape_cast %18 : vector<1x16x1xf32> to vector<16x1xf32>
    %20 = vector.broadcast %19 : vector<16x1xf32> to vector<16x128xf32>
    %21 = arith.addf %17, %20 : vector<16x128xf32>
    %cst_16 = arith.constant 5.000000e-01 : f32
    %22 = vector.broadcast %cst_16 : f32 to vector<16x128xf32>
    %23 = arith.mulf %22, %21 : vector<16x128xf32>
    %24 = math.tanh %23 : vector<16x128xf32>
    %cst_17 = arith.constant 1.000000e+00 : f32
    %25 = vector.broadcast %cst_17 : f32 to vector<16x128xf32>
    %26 = arith.addf %24, %25 : vector<16x128xf32>
    %cst_18 = arith.constant 5.000000e-01 : f32
    %27 = vector.broadcast %cst_18 : f32 to vector<16x128xf32>
    %28 = arith.mulf %27, %26 : vector<16x128xf32>
    %c2 = arith.constant 2 : index
    %c0_19 = arith.constant 0 : index
    %c0_20 = arith.constant 0 : index
    %29 = vector.load %arg2[%c2, %c0_19, %c0_20] : memref<4x16x16xf32, #tpu.memory_space<vmem>>, vector<1x8x16xf32>
    %30 = vector.shape_cast %29 : vector<1x8x16xf32> to vector<8x16xf32>
    %cst_21 = arith.constant dense<0.000000e+00> : vector<8x128xf32>
    %31 = tpu.matmul %30, %28, %cst_21 {dimension_numbers = #tpu.dot_dimension_numbers<[1], [0], [0], [1], [0, 0, 1, 1], [], []>} : vector<8x16xf32>, vector<16x128xf32>, vector<8x128xf32> -> vector<8x128xf32>
    %c2_22 = arith.constant 2 : index
    %c0_23 = arith.constant 0 : index
    %c0_24 = arith.constant 0 : index
    %32 = vector.load %arg3[%c2_22, %c0_23, %c0_24] : memref<4x16x1xf32, #tpu.memory_space<vmem>>, vector<1x8x1xf32>
    %33 = vector.shape_cast %32 : vector<1x8x1xf32> to vector<8x1xf32>
    %34 = vector.broadcast %33 : vector<8x1xf32> to vector<8x128xf32>
    %35 = arith.addf %31, %34 : vector<8x128xf32>
    %cst_25 = arith.constant 5.000000e-01 : f32
    %36 = vector.broadcast %cst_25 : f32 to vector<8x128xf32>
    %37 = arith.mulf %36, %35 : vector<8x128xf32>
    %38 = math.tanh %37 : vector<8x128xf32>
    %cst_26 = arith.constant 1.000000e+00 : f32
    %39 = vector.broadcast %cst_26 : f32 to vector<8x128xf32>
    %40 = arith.addf %38, %39 : vector<8x128xf32>
    %cst_27 = arith.constant 5.000000e-01 : f32
    %41 = vector.broadcast %cst_27 : f32 to vector<8x128xf32>
    %42 = arith.mulf %41, %40 : vector<8x128xf32>
    %c3 = arith.constant 3 : index
    %c0_28 = arith.constant 0 : index
    %c0_29 = arith.constant 0 : index
    %43 = vector.load %arg2[%c3, %c0_28, %c0_29] : memref<4x16x16xf32, #tpu.memory_space<vmem>>, vector<1x8x8xf32>
    %44 = vector.shape_cast %43 : vector<1x8x8xf32> to vector<8x8xf32>
    %cst_30 = arith.constant dense<0.000000e+00> : vector<8x128xf32>
    %45 = tpu.matmul %44, %42, %cst_30 {dimension_numbers = #tpu.dot_dimension_numbers<[1], [0], [0], [1], [0, 0, 1, 1], [], []>} : vector<8x8xf32>, vector<8x128xf32>, vector<8x128xf32> -> vector<8x128xf32>
    %c3_31 = arith.constant 3 : index
    %c0_32 = arith.constant 0 : index
    %c0_33 = arith.constant 0 : index
    %46 = vector.load %arg3[%c3_31, %c0_32, %c0_33] : memref<4x16x1xf32, #tpu.memory_space<vmem>>, vector<1x8x1xf32>
    %47 = vector.shape_cast %46 : vector<1x8x1xf32> to vector<8x1xf32>
    %48 = vector.broadcast %47 : vector<8x1xf32> to vector<8x128xf32>
    %49 = arith.addf %45, %48 : vector<8x128xf32>
    %cst_34 = arith.constant 5.000000e-01 : f32
    %50 = vector.broadcast %cst_34 : f32 to vector<8x128xf32>
    %51 = arith.mulf %50, %49 : vector<8x128xf32>
    %52 = math.tanh %51 : vector<8x128xf32>
    %cst_35 = arith.constant 1.000000e+00 : f32
    %53 = vector.broadcast %cst_35 : f32 to vector<8x128xf32>
    %54 = arith.addf %52, %53 : vector<8x128xf32>
    %cst_36 = arith.constant 5.000000e-01 : f32
    %55 = vector.broadcast %cst_36 : f32 to vector<8x128xf32>
    %56 = arith.mulf %55, %54 : vector<8x128xf32>
    %c0_37 = arith.constant 0 : index
    %c0_38 = arith.constant 0 : index
    %57 = vector.load %arg4[%c0_37, %c0_38] : memref<8x128xf32, #tpu.memory_space<vmem>>, vector<8x128xf32>
    tpu.vector_store %arg4[%c0_37, %c0_38], %56 {strides = array<i32>} : memref<8x128xf32, #tpu.memory_space<vmem>>, vector<8x128xf32>,
    return
  }
  func.func @transform_0(%arg0: i32) -> (i32, i32) {
    %c0_i32 = arith.constant 0 : i32
    %c0_i32_0 = arith.constant 0 : i32
    return %c0_i32, %arg0 : i32, i32
  }
  func.func @transform_1(%arg0: i32) -> (i32, i32, i32) {
    %c0_i32 = arith.constant 0 : i32
    %c0_i32_0 = arith.constant 0 : i32
    %c0_i32_1 = arith.constant 0 : i32
    %c0_i32_2 = arith.constant 0 : i32
    return %c0_i32, %c0_i32_0, %c0_i32_1 : i32, i32, i32
  }
  func.func @transform_2(%arg0: i32) -> (i32, i32, i32) {
    %c0_i32 = arith.constant 0 : i32
    %c0_i32_0 = arith.constant 0 : i32
    %c0_i32_1 = arith.constant 0 : i32
    %c0_i32_2 = arith.constant 0 : i32
    return %c0_i32, %c0_i32_0, %c0_i32_1 : i32, i32, i32
  }
  func.func @transform_3(%arg0: i32) -> (i32, i32) {
    %c0_i32 = arith.constant 0 : i32
    %c0_i32_0 = arith.constant 0 : i32
    return %c0_i32, %arg0 : i32, i32
  }
}

</mosaic_0001>

<bundles_post_ra>
// kernel: red_forward.1
= control target key start
LH: loop header
LB: loop body
LE: loop exit
PB: predicated region body
PF: predicated region fallthrough
CT: control target
= control target key end

     0   :  { %8 = vsyncpa [#allocation3], 0  ;;  %s711_s0 = inlined_call_operand.hbm [shape: f32[8,128], index: 0, kind: input, shape index: {}]   ;;  %s712_s1 = inlined_call_operand.hbm [shape: f32[4,16,16], index: 1, kind: input, shape index: {}]   ;;  %s713_s2 = inlined_call_operand.hbm [shape: f32[4,16,1], index: 2, kind: input, shape index: {}]   ;;  %s714_s3 = inlined_call_operand.hbm [shape: f32[8,128], index: 3, kind: output, shape index: {}]  }
   0x1   :  { %9 = vsyncpa [#allocation6], 0 }
   0x2   :  { %10 = vsyncpa [#allocation4], 0  ;;  %s621_s12 = smov [#allocation5]   ;;  %s527_s16 = scalar_lea.hbm %s712_s1, 1024 }
   0x3   :  { %s26_s13 = sshll.u32 %s621_s12, 4  ;;  %p528_p0 = scmp.ne.s32.totalorder %s712_s1, %s527_s16  ;;  %s27_s13 = int_to_ptr.vmem [resolvable:$true] %s26_s13 }
   0x4   :  { %p531_p1 = scmp.lt.u32.totalorder %s527_s16, %s712_s1 }
   0x6   :  { %p533_p2 = pnand %p531_p1, %p528_p0 }
   0x8   :  { %536 = shalt.err (!%p533_p2)
}
   0x9   :  { %s537_s21 = scalar_lea.vmem %s27_s13, 1024  ;;  %p542_p4 = scmp.lt.s32.totalorder %s27_s13, %s27_s13 }
   0xa   :  { %p538_p3 = scmp.ne.s32.totalorder %s27_s13, %s537_s21  ;;  %p543_p5 = scmp.lt.s32.totalorder %s537_s21, %s537_s21 }
   0xc   :  { %p544_p6 = por %p543_p5, %p542_p4 }
   0xe   :  { %p545_p7 = pnand %p544_p6, %p538_p3 }
  0x10   :  { %548 = shalt.err (!%p545_p7)
}
  0x11   :  { %s622_s22 = smov 128   ;;  %s623_s23 = smov 8  }
  0x12   :  { %32 = dma.hbm_to_vmem [thread:$0]  %s712_s1, 1024, %s27_s13, [#allocation6], %s622_s22, %s622_s22, %s623_s23  }
  0x13   :  { %s624_s26 = smov [#allocation2]   ;;  %s625_s28 = smov [#allocation7]  }
  0x14   :  { %s17_s27 = sshll.u32 %s624_s26, 4  ;;  %s38_s29 = sshll.u32 %s625_s28, 4  ;;  %s18_s27 = int_to_ptr.vmem [resolvable:$true] %s17_s27  ;;  %s39_s29 = int_to_ptr.vmem [resolvable:$true] %s38_s29 }
  0x15   :  { %s549_s5 = scalar_lea.hbm %s711_s0, 128 }
  0x16   :  { %p550_p8 = scmp.ne.s32.totalorder %s711_s0, %s549_s5  ;;  %p553_p9 = scmp.lt.u32.totalorder %s549_s5, %s711_s0 }
  0x18   :  { %p555_p10 = pnand %p553_p9, %p550_p8 }
  0x1a   :  { %558 = shalt.err (!%p555_p10)
}
  0x1b   :  { %s559_s1 = scalar_lea.vmem %s18_s27, 128  ;;  %p564_p12 = scmp.lt.s32.totalorder %s18_s27, %s18_s27 }
  0x1c   :  { %p560_p11 = scmp.ne.s32.totalorder %s18_s27, %s559_s1  ;;  %p565_p13 = scmp.lt.s32.totalorder %s559_s1, %s559_s1 }
  0x1e   :  { %p566_p0 = por %p565_p13, %p564_p12 }
  0x20   :  { %p567_p1 = pnand %p566_p0, %p560_p11 }
  0x22   :  { %570 = shalt.err (!%p567_p1)
}
  0x23   :  { %20 = dma.hbm_to_vmem [thread:$0]  %s711_s0, 128, %s18_s27, [#allocation3]  }
  0x24   :  { %s571_s14 = scalar_lea.hbm %s713_s2, 1024 }
  0x25   :  { %p572_p2 = scmp.ne.s32.totalorder %s713_s2, %s571_s14  ;;  %p575_p3 = scmp.lt.u32.totalorder %s571_s14, %s713_s2 }
  0x27   :  { %p577_p4 = pnand %p575_p3, %p572_p2 }
  0x29   :  { %580 = shalt.err (!%p577_p4)
}
  0x2a   :  { %s581_s19 = scalar_lea.vmem %s39_s29, 1024  ;;  %p586_p6 = scmp.lt.s32.totalorder %s39_s29, %s39_s29 }
  0x2b   :  { %p582_p5 = scmp.ne.s32.totalorder %s39_s29, %s581_s19  ;;  %p587_p7 = scmp.lt.s32.totalorder %s581_s19, %s581_s19 }
  0x2d   :  { %p588_p8 = por %p587_p7, %p586_p6 }
  0x2f   :  { %p589_p9 = pnand %p588_p8, %p582_p5 }
  0x31   :  { %592 = shalt.err (!%p589_p9)
}
  0x32   :  { %44 = dma.hbm_to_vmem [thread:$0]  %s713_s2, 1024, %s39_s29, [#allocation6], %s622_s22, %s622_s22, %s623_s23  }
  0x33   :  { %615 = dma.done.wait [#allocation3], 128  }
  0x34   :  { %616 = vsyncadd [#allocation3], 4294967168 }
  0x35   :  { %617 = dma.done.wait [#allocation6], 2048  }
  0x36   :  { %618 = vsyncadd [#allocation6], 4294965248  ;;  %v626_v0 = vmov 0   ;;  %vm69_vm0 = vcmask 64512   ;;  %v54_v1 = vld [vmem:[#allocation2] sm:$0xff]  ;;  %v55_v2 = vld [vmem:[#allocation5] sm:$0xff] }
  0x37   :  { %513 = vset.pattern.permute.xlu0 %v626_v0  ;;  %514 = vset.pattern.permute.xlu1 %v626_v0  ;;  %v56_v3 = vld [vmem:[#allocation5 + $0x8] sm:$0xff]  ;;  %v57_v4 = vld [vmem:[#allocation7] sm:$0xff]  ;;  %v160_v7 = vld [vmem:[#allocation5 + $0x10] sm:$0xff]  ;;  %vm175_vm1 = vcmask 130048   ;;  %v627_v27 = vmov 0.0|0.0   ;;  %vm628_vm2 = vmmov 0  }
  0x38   :  { %472 = vmatprep.subr.mxu0 %v54_v1  ;;  %474 = vmatprep.mubr.msk.f32.mxu0 %vm69_vm0, %v55_v2  ;;  %v58_v5 = vld [vmem:[#allocation7 + $0x8] sm:$0xff]  ;;  %v268_v6 = vld [vmem:[#allocation7 + $0x20] sm:$0xff]  ;;  %v163_v8 = vld [vmem:[#allocation7 + $0x10] sm:$0xff]  ;;  %v629_v28 = vmov 0.0   ;;  %s630_s2 = smov [#allocation8]  }
  0x39   :  { %473 = vmatpush3.msra.mxu0 %v54_v1  ;;  %61 = vperm.xlu0 %513, %v57_v4   ;;  %v164_v9 = vld [vmem:[#allocation7 + $0x18] sm:$0xff]  ;;  %v354_v10 = vld [vmem:[#allocation7 + $0x30] sm:$0xff]  ;;  %v266_v44 = vld [vmem:[#allocation5 + $0x20] sm:$0xff]  ;;  %s444_s21 = sshll.u32 %s630_s2, 4  ;;  %s445_s21 = int_to_ptr.vmem [resolvable:$true] %s444_s21 }
  0x3a   :  { %475 = vmatmul.mubr.msk.f32.vlgmr.msra.gmra.mrb[0].mxu0 %vm69_vm0, %v56_v3  ;;  %481 = vmatprep.mubr.msk.f32.mxu1 %vm175_vm1, %v160_v7  ;;  %v161_v26 = vld [vmem:[#allocation5 + $0x18] sm:$0xff]  ;;  %v352_v53 = vld [vmem:[#allocation5 + $0x30] sm:$0xff]  ;;  %s593_s22 = scalar_lea.vmem %s445_s21, 128  ;;  %p598_p11 = scmp.lt.s32.totalorder %s445_s21, %s445_s21 }
  0x3b   :  { %167 = vperm.xlu1 %514, %v163_v8   ;;  %500 = vmatprep.subr.bf16.mxu0 %v627_v27  ;;  %p594_p10 = scmp.ne.s32.totalorder %s445_s21, %s593_s22  ;;  %p599_p12 = scmp.lt.s32.totalorder %s593_s22, %s593_s22 }
  0x3c   :  { %488 = vmatprep.mubr.msk.f32.mxu0 %vm628_vm2, %v629_v28 }
  0x3d   :  { %66 = vperm.xlu0 %513, %v58_v5   ;;  %p600_p13 = por %p599_p12, %p598_p11 }
  0x3f   :  { %172 = vperm.xlu1 %514, %v164_v9   ;;  %p601_p0 = pnand %p600_p13, %p594_p10 }
  0x41   :  { %271 = vperm.xlu0 %513, %v268_v6  }
  0x43   :  { %357 = vperm.xlu1 %514, %v354_v10  }
  0xb8   :  { %v62_v11 = vpop.permute.xlu0 %61 }
  0xba   :  { %v168_v29 = vpop.permute.xlu1 %167 }
  0xbc   :  { %v67_v12 = vpop.permute.xlu0 %66 }
  0xbe   :  { %v173_v30 = vpop.permute.xlu1 %172 }
  0xc0   :  { %v272_v45 = vpop.permute.xlu0 %271 }
  0xc2   :  { %v358_v54 = vpop.permute.xlu1 %357 }
 0x10d   :  { %v476_v13 = vpop.f32.mrb[0].mxu0 }
 0x10e   :  { %v148_v14 = vadd.f32 %v476_v13, %v67_v12  ;;  %v142_v15 = vpop.f32.mrb[1].mxu0 }
 0x10f   :  { %v143_v16 = vadd.f32 %v142_v15, %v62_v11 }
 0x110   :  { %v152_v17 = vmul.f32 0.5, %v148_v14 }
 0x111   :  { %v151_v18 = vmul.f32 0.5, %v143_v16 }
 0x112   :  { %515 = vtanh.f32 %v152_v17 }
 0x113   :  { %517 = vtanh.f32 %v151_v18 }
 0x11c   :  { %v516_v19 = vpop.eup %515 }
 0x11d   :  { %v518_v20 = vpop.eup %517  ;;  %v156_v21 = vadd.f32 1.0, %v516_v19 }
 0x11e   :  { %v155_v22 = vadd.f32 1.0, %v518_v20 }
 0x11f   :  { %v158_v23 = vmul.f32 0.5, %v156_v21 }
 0x120   :  { %v157_v24 = vmul.f32 0.5, %v155_v22 }
 0x122   :  { %v496_v25 = vpack.c.bf16 %v158_v23, %v157_v24 }
 0x124   :  { %497 = vmatprep.subr.bf16.mxu1 %v496_v25 }
 0x125   :  { %499 = vmatpush3.bf16.msra.mxu1 %v496_v25 }
 0x126   :  { %491 = vmatprep.subr.mxu1 %v629_v28 }
 0x128   :  { %482 = vmatmul.mubr.msk.f32.vlgmr.msra.gmra.mrb[0].mxu1 %vm175_vm1, %v161_v26 }
 0x129   :  { %493 = vmatprep.mubr.msk.f32.mxu1 %vm628_vm2, %v629_v28 }
 0x1fb   :  { %v483_v31 = vpop.f32.mrb[0].mxu1 }
 0x1fc   :  { %v254_v32 = vadd.f32 %v483_v31, %v173_v30  ;;  %v248_v33 = vpop.f32.mrb[1].mxu1 }
 0x1fd   :  { %v249_v34 = vadd.f32 %v248_v33, %v168_v29 }
 0x1fe   :  { %v258_v35 = vmul.f32 0.5, %v254_v32 }
 0x1ff   :  { %v257_v36 = vmul.f32 0.5, %v249_v34 }
 0x200   :  { %519 = vtanh.f32 %v258_v35 }
 0x201   :  { %521 = vtanh.f32 %v257_v36 }
 0x20a   :  { %v520_v37 = vpop.eup %519 }
 0x20b   :  { %v522_v38 = vpop.eup %521  ;;  %v262_v39 = vadd.f32 1.0, %v520_v37 }
 0x20c   :  { %v261_v40 = vadd.f32 1.0, %v522_v38 }
 0x20d   :  { %v264_v41 = vmul.f32 0.5, %v262_v39 }
 0x20e   :  { %v263_v42 = vmul.f32 0.5, %v261_v40 }
 0x210   :  { %v501_v43 = vpack.c.bf16 %v264_v41, %v263_v42 }
 0x212   :  { %502 = vmatpush3.bf16.msra.mxu0 %v501_v43 }
 0x215   :  { %489 = vmatmul.mubr.msk.f32.vlgmr.msra.gmra.mrb[2].mxu0 %vm175_vm1, %v266_v44 }
 0x2e8   :  { %v343_v46 = vpop.f32.mrb[2].mxu0 }
 0x2e9   :  { %v344_v47 = vadd.f32 %v343_v46, %v272_v45  ;;  %v490_v48 = vpop.f32.mrb[3].mxu0 }
 0x2eb   :  { %v347_v49 = vmul.f32 0.5, %v344_v47 }
 0x2ed   :  { %523 = vtanh.f32 %v347_v49 }
 0x2f7   :  { %v524_v50 = vpop.eup %523 }
 0x2f8   :  { %v349_v51 = vadd.f32 1.0, %v524_v50 }
 0x2fa   :  { %v350_v52 = vmul.f32 0.5, %v349_v51 }
 0x2fc   :  { %492 = vmatpush3.msra.mxu1 %v350_v52 }
 0x2fd   :  { %494 = vmatmul.mubr.msk.f32.vlgmr.msra.gmra.mrb[2].mxu1 %vm69_vm0, %v352_v53 }
 0x3d0   :  { %v429_v55 = vpop.f32.mrb[2].mxu1 }
 0x3d1   :  { %v430_v56 = vadd.f32 %v429_v55, %v358_v54  ;;  %v495_v57 = vpop.f32.mrb[3].mxu1 }
 0x3d3   :  { %v433_v58 = vmul.f32 0.5, %v430_v56 }
 0x3d5   :  { %525 = vtanh.f32 %v433_v58 }
 0x3df   :  { %v526_v59 = vpop.eup %525 }
 0x3e0   :  { %v435_v60 = vadd.f32 1.0, %v526_v59 }
 0x3e2   :  { %v436_v61 = vmul.f32 0.5, %v435_v60 }
 0x3e4   :  { %437 = vst [vmem:[#allocation8] sm:$0xff] %v436_v61 }
 0x3e5   :  { %604 = shalt.err (!%p601_p0)
}
 0x3e6   :  { %s605_s25 = scalar_lea.hbm %s714_s3, 128 }
 0x3e7   :  { %p606_p1 = scmp.ne.s32.totalorder %s714_s3, %s605_s25  ;;  %p609_p2 = scmp.lt.u32.totalorder %s605_s25, %s714_s3 }
 0x3e9   :  { %p611_p3 = pnand %p609_p2, %p606_p1 }
 0x3eb   :  { %614 = shalt.err (!%p611_p3)
}
 0x3ec   :  { %447 = dma.vmem_to_hbm [thread:$0]  %s445_s21, 128, %s714_s3, [#allocation4]  }
 0x3ed   :  { %619 = dma.done.wait [#allocation4], 128  }
 0x3ee   :  { %620 = vsyncadd [#allocation4], 4294967168 }
 0x3ef   :  { %451 = vsyncpa [#allocation3], 1 }
 0x3f0   :  { %452 = vsyncpa [#allocation6], 1 }
 0x3f1   :  { %453 = vsyncpa [#allocation4], 1 }

</bundles_post_ra>
